<compile_context>
chip_gen: v7x
topology: tpu7x:2x2x1
jax: 0.10.0
libtpu: 0.0.40
codegen_flags: <defaults>
</compile_context>

<pallas_src>
import jax
import jax.numpy as jnp
from jax.experimental import pallas as pl
from jax.experimental.pallas import tpu as pltpu


# ------------------------------ Pallas kernel ------------------------------
def _locked_dropout_kernel(x_ref, m_ref, o_ref):
    """o[t0:t0+TT] = x[t0:t0+TT] * locked_mask.

    x_ref : VMEM [TT, B, C]  current time-tile
    m_ref : VMEM [B, C]      Bernoulli(1-p)/(1-p) mask, shared by all tiles
    o_ref : VMEM [TT, B, C]
    """
    # Apply the mask in f32 and cast once at the store (exact for f32 inputs,
    # avoids rounding the keep-scale for low-precision inputs).
    o_ref[...] = (x_ref[...].astype(jnp.float32) * m_ref[...][None, :, :]
                  ).astype(o_ref.dtype)


# ------------------------------ JAX wrapper --------------------------------
def _locked_mask(key, b, c, rate):
    """One scaled Bernoulli(1-p) mask of shape (B, C), f32."""
    keep = jax.random.bernoulli(key, p=1.0 - rate, shape=(b, c))
    return keep.astype(jnp.float32) * jnp.float32(1.0 / (1.0 - rate))


def locked_dropout(x, key, rate=0.5, training=True, *, max_tile_bytes=3 << 20):
    """x: [T, B, C]. Mask is shared over axis 0, exactly like the PyTorch module."""
    if (not training) or rate == 0.0:
        return x  # identity path of LockedDropout.forward

    t, b, c = x.shape
    mask = _locked_mask(key, b, c, rate)           # drawn ONCE, like PyTorch

    # Time-tile sizing: one block if the whole tensor fits the budget,
    # otherwise cap the tile (~3 MiB -> 4 pipelined buffers fit v5e's 16 MiB
    # scoped VMEM) but keep >= 4 grid steps so v7x's two TCs both get work.
    row_bytes = b * c * x.dtype.itemsize
    if t * row_bytes <= max_tile_bytes:
        tt = t
    else:
        tt = max(1, min(max_tile_bytes // row_bytes, pl.cdiv(t, 4)))
    grid = (pl.cdiv(t, tt),)

    return pl.pallas_call(
        _locked_dropout_kernel,
        out_shape=jax.ShapeDtypeStruct((t, b, c), x.dtype),
        grid_spec=pltpu.PrefetchScalarGridSpec(
            num_scalar_prefetch=0,
            grid=grid,
            in_specs=[
                pl.BlockSpec((tt, b, c), lambda i: (i, 0, 0)),   # time tile
                pl.BlockSpec((b, c), lambda i: (0, 0)),          # shared mask
            ],
            out_specs=pl.BlockSpec((tt, b, c), lambda i: (i, 0, 0)),
        ),
        compiler_params=pltpu.CompilerParams(
            dimension_semantics=("parallel",)),   # v7x: split time tiles over both TCs
    )(x, mask)
    # TODO(synk): when the caller can overwrite x, add input_output_aliases={0: 0}
    # (or fuse this multiply into the adjacent RNN matmul) to halve HBM traffic.


# --------------------------------- main -------------------------------------
if __name__ == "__main__":
    T, B, C = 8, 8, 128          # (seq, batch, features); C=128 keeps stores lane-dense
    RATE = 0.5

    root = jax.random.PRNGKey(0)
    data_key, drop_key = jax.random.split(root)
    # strictly positive inputs so the applied mask can be recovered as y / x
    x = jax.random.uniform(data_key, (T, B, C), jnp.float32, minval=0.5, maxval=1.5)

    # --- eval mode / dropout=0: identity (no kernel launched, like PyTorch) ---
    y_eval = locked_dropout(x, drop_key, rate=RATE, training=False)
    assert jnp.array_equal(y_eval, x)
    y_zero = locked_dropout(x, drop_key, rate=0.0, training=True)
    assert jnp.array_equal(y_zero, x)

    # --- training mode: run the Pallas kernel ---
    y = locked_dropout(x, drop_key, rate=RATE, training=True)
    y = jax.block_until_ready(y)
    assert y.shape == x.shape

    # Exact reference: same mask draw, broadcast multiply in plain JAX.
    mask_ref = _locked_mask(drop_key, B, C, RATE)
    y_ref = (x.astype(jnp.float32) * mask_ref[None, :, :]).astype(x.dtype)
    assert jnp.array_equal(y, y_ref), "kernel output differs from reference"

    # Structural LockedDropout invariants:
    scale = 1.0 / (1.0 - RATE)
    ratio = y / x                                        # x > 0 everywhere
    is_zero = jnp.abs(ratio) < 1e-6                      # dropped
    is_scaled = jnp.abs(ratio - scale) < 1e-4            # kept & rescaled
    # 1) every element is either dropped or scaled by exactly 1/(1-p)
    assert bool(jnp.all(is_zero | is_scaled)), "elements not of form {0, x/(1-p)}"
    # 2) the mask is locked: identical (batch, feature) pattern at every timestep
    assert bool(jnp.all(is_zero == is_zero[0][None, :, :])), "mask differs across time"
    # 3) drop rate is plausible for Bernoulli(p=0.5) over 8*128 mask entries
    kept_frac = float(1.0 - jnp.mean(is_zero.astype(jnp.float32)))
    assert 0.2 < kept_frac < 0.8, f"implausible keep fraction {kept_frac}"

    print("KERNEL_OK")
</pallas_src>

<mosaic_0001>
module attributes {stable_mosaic.version = 11 : i64} {
  func.func @_locked_dropout_kernel(%arg0: i32, %arg1: memref<8x8x128xf32, #tpu.memory_space<vmem>>, %arg2: memref<8x128xf32, #tpu.memory_space<vmem>>, %arg3: memref<8x8x128xf32, #tpu.memory_space<vmem>>) attributes {dimension_semantics = [#tpu.dimension_semantics<parallel>], iteration_bounds = array<i64: 1>, scalar_prefetch = 0 : i64, scratch_operands = 0 : i64, tpu.core_type = #tpu.core_type<tc>, window_params = [{transform_indices = @transform_0, window_bounds = array<i64: 8, 8, 128>}, {pipeline_mode = #tpu.pipeline_mode<synchronous>, transform_indices = @transform_1, window_bounds = array<i64: 8, 128>}, {transform_indices = @transform_2, window_bounds = array<i64: 8, 8, 128>}]} {
    %c0 = arith.constant 0 : index
    %c0_0 = arith.constant 0 : index
    %c0_1 = arith.constant 0 : index
    %0 = vector.load %arg1[%c0, %c0_0, %c0_1] : memref<8x8x128xf32, #tpu.memory_space<vmem>>, vector<8x8x128xf32>
    %c0_2 = arith.constant 0 : index
    %c0_3 = arith.constant 0 : index
    %1 = vector.load %arg2[%c0_2, %c0_3] : memref<8x128xf32, #tpu.memory_space<vmem>>, vector<8x128xf32>
    %2 = vector.shape_cast %1 : vector<8x128xf32> to vector<1x8x128xf32>
    %3 = vector.broadcast %2 : vector<1x8x128xf32> to vector<8x8x128xf32>
    %4 = arith.mulf %0, %3 : vector<8x8x128xf32>
    %c0_4 = arith.constant 0 : index
    %c0_5 = arith.constant 0 : index
    %c0_6 = arith.constant 0 : index
    %5 = vector.load %arg3[%c0_4, %c0_5, %c0_6] : memref<8x8x128xf32, #tpu.memory_space<vmem>>, vector<8x8x128xf32>
    tpu.vector_store %arg3[%c0_4, %c0_5, %c0_6], %4 {strides = array<i32>} : memref<8x8x128xf32, #tpu.memory_space<vmem>>, vector<8x8x128xf32>,
    return
  }
  func.func @transform_0(%arg0: i32) -> (i32, i32, i32) {
    %c0_i32 = arith.constant 0 : i32
    %c0_i32_0 = arith.constant 0 : i32
    %c0_i32_1 = arith.constant 0 : i32
    return %arg0, %c0_i32, %c0_i32_0 : i32, i32, i32
  }
  func.func @transform_1(%arg0: i32) -> (i32, i32) {
    %c0_i32 = arith.constant 0 : i32
    %c0_i32_0 = arith.constant 0 : i32
    %c0_i32_1 = arith.constant 0 : i32
    return %c0_i32, %c0_i32_0 : i32, i32
  }
  func.func @transform_2(%arg0: i32) -> (i32, i32, i32) {
    %c0_i32 = arith.constant 0 : i32
    %c0_i32_0 = arith.constant 0 : i32
    %c0_i32_1 = arith.constant 0 : i32
    return %arg0, %c0_i32, %c0_i32_0 : i32, i32, i32
  }
}

</mosaic_0001>

<bundles_post_ra>
// kernel: tpu_custom_call.1
= control target key start
LH: loop header
LB: loop body
LE: loop exit
PB: predicated region body
PF: predicated region fallthrough
CT: control target
= control target key end

     0   :  { %7 = vsyncpa [#allocation3], 0  ;;  %s220_s0 = inlined_call_operand.hbm [shape: f32[8,8,128], index: 0, kind: input, shape index: {}]   ;;  %s221_s1 = inlined_call_operand.hbm [shape: f32[8,128], index: 1, kind: input, shape index: {}]   ;;  %s222_s2 = inlined_call_operand.hbm [shape: f32[8,8,128], index: 2, kind: output, shape index: {}]  }
   0x1   :  { %8 = vsyncpa [#allocation6], 0 }
   0x2   :  { %9 = vsyncpa [#allocation4], 0  ;;  %s158_s9 = smov [#allocation2]   ;;  %s86_s13 = scalar_lea.hbm %s220_s0, 1024 }
   0x3   :  { %s15_s10 = sshll.u32 %s158_s9, 4  ;;  %p87_p0 = scmp.ne.s32.totalorder %s220_s0, %s86_s13  ;;  %s16_s10 = int_to_ptr.vmem [resolvable:$true] %s15_s10 }
   0x4   :  { %p90_p1 = scmp.lt.u32.totalorder %s86_s13, %s220_s0 }
   0x6   :  { %p92_p2 = pnand %p90_p1, %p87_p0 }
   0x8   :  { %95 = shalt.err (!%p92_p2)
}
   0x9   :  { %s96_s18 = scalar_lea.vmem %s16_s10, 1024  ;;  %p101_p4 = scmp.lt.s32.totalorder %s16_s10, %s16_s10 }
   0xa   :  { %p97_p3 = scmp.ne.s32.totalorder %s16_s10, %s96_s18  ;;  %p102_p5 = scmp.lt.s32.totalorder %s96_s18, %s96_s18 }
   0xc   :  { %p103_p6 = por %p102_p5, %p101_p4 }
   0xe   :  { %p104_p7 = pnand %p103_p6, %p97_p3 }
  0x10   :  { %107 = shalt.err (!%p104_p7)
}
  0x11   :  { %s159_s19 = smov 128   ;;  %s160_s20 = smov 8  }
  0x12   :  { %21 = dma.hbm_to_vmem [thread:$0]  %s220_s0, 1024, %s16_s10, [#allocation3], %s159_s19, %s159_s19, %s160_s20  }
  0x13   :  { %s161_s23 = smov [#allocation5]   ;;  %s108_s27 = scalar_lea.hbm %s221_s1, 128 }
  0x14   :  { %s28_s24 = sshll.u32 %s161_s23, 4  ;;  %p109_p8 = scmp.ne.s32.totalorder %s221_s1, %s108_s27  ;;  %s29_s24 = int_to_ptr.vmem [resolvable:$true] %s28_s24 }
  0x15   :  { %p112_p9 = scmp.lt.u32.totalorder %s108_s27, %s221_s1 }
  0x17   :  { %p114_p10 = pnand %p112_p9, %p109_p8 }
  0x19   :  { %117 = shalt.err (!%p114_p10)
}
  0x1a   :  { %s118_s4 = scalar_lea.vmem %s29_s24, 128  ;;  %p123_p12 = scmp.lt.s32.totalorder %s29_s24, %s29_s24 }
  0x1b   :  { %p119_p11 = scmp.ne.s32.totalorder %s29_s24, %s118_s4  ;;  %p124_p13 = scmp.lt.s32.totalorder %s118_s4, %s118_s4 }
  0x1d   :  { %p125_p0 = por %p124_p13, %p123_p12 }
  0x1f   :  { %p126_p1 = pnand %p125_p0, %p119_p11 }
  0x21   :  { %129 = shalt.err (!%p126_p1)
}
  0x22   :  { %31 = dma.hbm_to_vmem [thread:$0]  %s221_s1, 128, %s29_s24, [#allocation6]  }
  0x23   :  { %152 = dma.done.wait [#allocation3], 1024  }
  0x24   :  { %153 = vsyncadd [#allocation3], 4294966272 }
  0x25   :  { %154 = dma.done.wait [#allocation6], 128  }
  0x26   :  { %155 = vsyncadd [#allocation6], 4294967168  ;;  %v38_v0 = vld [vmem:[#allocation2] sm:$0xff]  ;;  %v39_v2 = vld [vmem:[#allocation2 + $0x8] sm:$0xff]  ;;  %s162_s6 = smov [#allocation7]  }
  0x27   :  { %v46_v1 = vld [vmem:[#allocation5] sm:$0xff]  ;;  %s68_s7 = sshll.u32 %s162_s6, 4  ;;  %v40_v5 = vld [vmem:[#allocation2 + $0x10] sm:$0xff]  ;;  %v41_v6 = vld [vmem:[#allocation2 + $0x18] sm:$0xff]  ;;  %s69_s7 = int_to_ptr.vmem [resolvable:$true] %s68_s7 }
  0x28   :  { %v47_v3 = vmul.f32 %v46_v1, %v38_v0  ;;  %v48_v4 = vmul.f32 %v46_v1, %v39_v2  ;;  %v42_v7 = vld [vmem:[#allocation2 + $0x20] sm:$0xff]  ;;  %v49_v8 = vmul.f32 %v46_v1, %v40_v5  ;;  %v50_v9 = vmul.f32 %v46_v1, %v41_v6  ;;  %v43_v11 = vld [vmem:[#allocation2 + $0x28] sm:$0xff]  ;;  %v44_v12 = vld [vmem:[#allocation2 + $0x30] sm:$0xff]  ;;  %s130_s1 = scalar_lea.vmem %s69_s7, 1024  ;;  %p135_p3 = scmp.lt.s32.totalorder %s69_s7, %s69_s7 }
  0x29   :  { %v51_v10 = vmul.f32 %v46_v1, %v42_v7  ;;  %v45_v13 = vld [vmem:[#allocation2 + $0x38] sm:$0xff]  ;;  %v52_v14 = vmul.f32 %v46_v1, %v43_v11  ;;  %v53_v15 = vmul.f32 %v46_v1, %v44_v12  ;;  %p131_p2 = scmp.ne.s32.totalorder %s69_s7, %s130_s1  ;;  %p136_p4 = scmp.lt.s32.totalorder %s130_s1, %s130_s1 }
  0x2a   :  { %55 = vst [vmem:[#allocation7] sm:$0xff] %v47_v3  ;;  %56 = vst [vmem:[#allocation7 + $0x8] sm:$0xff] %v48_v4  ;;  %v54_v16 = vmul.f32 %v46_v1, %v45_v13 }
  0x2b   :  { %57 = vst [vmem:[#allocation7 + $0x10] sm:$0xff] %v49_v8  ;;  %58 = vst [vmem:[#allocation7 + $0x18] sm:$0xff] %v50_v9  ;;  %p137_p5 = por %p136_p4, %p135_p3 }
  0x2c   :  { %59 = vst [vmem:[#allocation7 + $0x20] sm:$0xff] %v51_v10  ;;  %60 = vst [vmem:[#allocation7 + $0x28] sm:$0xff] %v52_v14 }
  0x2d   :  { %61 = vst [vmem:[#allocation7 + $0x30] sm:$0xff] %v53_v15  ;;  %62 = vst [vmem:[#allocation7 + $0x38] sm:$0xff] %v54_v16  ;;  %p138_p6 = pnand %p137_p5, %p131_p2 }
  0x2f   :  { %141 = shalt.err (!%p138_p6)
}
  0x30   :  { %s142_s10 = scalar_lea.hbm %s222_s2, 1024 }
  0x31   :  { %p143_p7 = scmp.ne.s32.totalorder %s222_s2, %s142_s10  ;;  %p146_p8 = scmp.lt.u32.totalorder %s142_s10, %s222_s2 }
  0x33   :  { %p148_p9 = pnand %p146_p8, %p143_p7 }
  0x35   :  { %151 = shalt.err (!%p148_p9)
}
  0x36   :  { %74 = dma.vmem_to_hbm [thread:$0]  %s69_s7, 1024, %s222_s2, [#allocation4], %s159_s19, %s159_s19, %s160_s20  }
  0x37   :  { %156 = dma.done.wait [#allocation4], 1024  }
  0x38   :  { %157 = vsyncadd [#allocation4], 4294966272 }
  0x39   :  { %78 = vsyncpa [#allocation3], 1 }
  0x3a   :  { %79 = vsyncpa [#allocation6], 1 }
  0x3b   :  { %80 = vsyncpa [#allocation4], 1 }

</bundles_post_ra>
